<compile_context>
chip_gen: v5e
topology: v5e:2x2
jax: 0.10.0
libtpu: 0.0.40
codegen_flags: <defaults>
</compile_context>

<pallas_src>
import functools

import jax
import jax.numpy as jnp
from jax.experimental import pallas as pl
from jax.experimental.pallas import tpu as pltpu


# ----------------------------- Pallas kernel ------------------------------ #
def mlp_kernel(x_ref, w1_ref, b1_ref, w2_ref, b2_ref, w3_ref, b3_ref, o_ref):
    # x_ref: [th, TM] (rows on lanes); weights pre-transposed to [out, in];
    # biases as [out, 1] columns so they broadcast across lanes.
    x = x_ref[...]
    h = jnp.dot(w1_ref[...], x, preferred_element_type=jnp.float32) + b1_ref[...]
    h = jnp.maximum(h, 0.0)                                           # ReLU
    h = jnp.dot(w2_ref[...], h, preferred_element_type=jnp.float32) + b2_ref[...]
    h = jnp.maximum(h, 0.0)                                           # ReLU
    o = jnp.dot(w3_ref[...], h, preferred_element_type=jnp.float32) + b3_ref[...]
    o_ref[...] = o.astype(o_ref.dtype)                                # [tf, TM]


# ------------------------------ wrapper ----------------------------------- #
def _round_up(x, m):
    return ((x + m - 1) // m) * m


def _choose_tiling(m, tile_m):
    """Pick (rows_per_tile, num_tiles) for the lane (row) axis.

    * rows are padded to a multiple of 128 (lane width) only;
    * small problems collapse to a single grid step;
    * multi-tile grids use an even step count (both v7x TensorCores get work)
      and keep total padding bounded by ~128 rows per step, not tile_m-1.
    """
    m128 = _round_up(max(m, 1), 128)
    tile_m = max(_round_up(tile_m, 128), 128)
    if m128 <= tile_m:
        return m128, 1
    g = pl.cdiv(m128, tile_m)
    g += g & 1                                   # even number of steps
    tm = _round_up(pl.cdiv(m128, g), 128)
    return tm, g


@functools.partial(jax.jit, static_argnames=("embed_spacetime", "tile_m"))
def custom_mlp_forward(u, dx, dt, params, embed_spacetime=False, tile_m=16384):
    """u: [batch, nx, time_history]; dx/dt: [batch] (unused unless embed_spacetime)."""
    del dx, dt  # only consumed when embed_spacetime=True
    # TODO(synk): embed_spacetime=True path is shape-inconsistent in the
    # reference module (first Linear sized with time_history, not +2); only the
    # default embed_spacetime=False path is implemented.
    assert not embed_spacetime

    b, nx, th = u.shape
    (w1, b1), (w2, b2), (w3, b3) = params
    h0, h1, tf = w1.shape[1], w2.shape[1], w3.shape[1]

    M = b * nx
    tm, g = _choose_tiling(M, tile_m)
    m_pad = tm * g

    x = u.reshape(M, th)
    if m_pad != M:
        x = jnp.pad(x, ((0, m_pad - M), (0, 0)))
    # Rows -> lanes. Under jit, pad + transpose fuse into one HBM copy.
    x_t = x.T                                    # [th, m_pad]

    # Pre-transpose params for the [feat, M] orientation (done once, tiny).
    w1t, b1t = w1.T, b1.T                        # [h0, th], [h0, 1]
    w2t, b2t = w2.T, b2.T                        # [h1, h0], [h1, 1]
    w3t, b3t = w3.T, b3.T                        # [tf, h1], [tf, 1]

    def resident(shape):
        nd = len(shape)
        return pl.BlockSpec(shape, lambda i, _nd=nd: (0,) * _nd)

    dsize = jnp.dtype(u.dtype).itemsize
    flops = 2 * m_pad * (th * h0 + h0 * h1 + h1 * tf)
    bytes_accessed = (
        m_pad * (th + tf) * dsize
        + (th * h0 + h0 + h0 * h1 + h1 + h1 * tf + tf) * dsize
    )

    out_t = pl.pallas_call(
        mlp_kernel,
        out_shape=jax.ShapeDtypeStruct((tf, m_pad), u.dtype),
        grid=(g,),
        in_specs=[
            pl.BlockSpec((th, tm), lambda i: (0, i)),     # activations: tiled on lanes
            resident(w1t.shape), resident(b1t.shape),     # params: resident in VMEM
            resident(w2t.shape), resident(b2t.shape),
            resident(w3t.shape), resident(b3t.shape),
        ],
        out_specs=pl.BlockSpec((tf, tm), lambda i: (0, i)),   # lane-dense stores
        compiler_params=pltpu.CompilerParams(
            dimension_semantics=("parallel",),            # 2 TCs on v7x
            vmem_limit_bytes=32 * 1024 * 1024,            # lifts v5e's 16 MiB default
        ),
        cost_estimate=pl.CostEstimate(
            flops=flops, transcendentals=0, bytes_accessed=bytes_accessed),
    )(x_t, w1t, b1t, w2t, b2t, w3t, b3t)

    # Under jit, transpose + slice + reshape fuse into one HBM copy.
    out = out_t.T[:M]                            # [M, tf]
    return out.reshape(b, nx, tf)


# --------------------------- parameter setup ------------------------------ #
def init_linear(key, in_dim, out_dim, dtype=jnp.float32):
    """Deterministic init mimicking torch.nn.Linear (U(-1/sqrt(in), 1/sqrt(in))).

    Weight stored as [in, out] (reference computes x @ W, matching PyTorch's
    x @ W.T + b). Bias stored as [1, out].
    """
    kw, kb = jax.random.split(key)
    bound = 1.0 / jnp.sqrt(in_dim)
    w = jax.random.uniform(kw, (in_dim, out_dim), dtype, minval=-bound, maxval=bound)
    b = jax.random.uniform(kb, (1, out_dim), dtype, minval=-bound, maxval=bound)
    return w, b


def make_params(key, time_history, hidden_channels, time_future):
    sizes = [time_history] + list(hidden_channels) + [time_future]
    keys = jax.random.split(key, len(sizes) - 1)
    return [init_linear(k, sizes[i], sizes[i + 1]) for i, k in enumerate(keys)]


# ------------------------------ reference --------------------------------- #
def custom_mlp_reference(u, params):
    b, nx, th = u.shape
    x = u.reshape(b * nx, th)
    (w1, b1), (w2, b2), (w3, b3) = params
    h = jnp.maximum(x @ w1 + b1, 0.0)
    h = jnp.maximum(h @ w2 + b2, 0.0)
    o = h @ w3 + b3
    return o.reshape(b, nx, -1)


# -------------------------------- main ------------------------------------ #
if __name__ == "__main__":
    time_history = 4
    time_future = 4
    hidden_channels = [32, 32]

    key = jax.random.PRNGKey(0)
    k_u, k_dx, k_dt, k_p, k_u2 = jax.random.split(key, 5)
    params = make_params(k_p, time_history, hidden_channels, time_future)

    # Test 1: small shapes, single-tile grid (grid=(1,)).
    batch, nx = 2, 16
    u = jax.random.normal(k_u, (batch, nx, time_history), jnp.float32)
    dx = jax.random.uniform(k_dx, (batch,), jnp.float32)
    dt = jax.random.uniform(k_dt, (batch,), jnp.float32)

    out = custom_mlp_forward(u, dx, dt, params, embed_spacetime=False)
    out = jax.block_until_ready(out)
    ref = custom_mlp_reference(u, params)
    assert out.shape == (batch, nx, time_future)
    assert jnp.allclose(out, ref, atol=1e-5, rtol=1e-5)

    # Test 2: M not a multiple of the tile or of 128, multi-step grid
    # (exercises padding, slicing, and the pipelined "parallel" grid axis).
    batch2, nx2 = 3, 1000                        # M = 3000 -> 6 tiles of 512
    u2 = jax.random.normal(k_u2, (batch2, nx2, time_history), jnp.float32)
    dx2 = jnp.ones((batch2,), jnp.float32)
    dt2 = jnp.ones((batch2,), jnp.float32)

    out2 = custom_mlp_forward(u2, dx2, dt2, params, embed_spacetime=False,
                              tile_m=512)
    out2 = jax.block_until_ready(out2)
    ref2 = custom_mlp_reference(u2, params)
    assert out2.shape == (batch2, nx2, time_future)
    assert jnp.allclose(out2, ref2, atol=1e-5, rtol=1e-5)

    print("KERNEL_OK")
</pallas_src>

<mosaic_0001>
module attributes {stable_mosaic.version = 11 : i64} {
  func.func @mlp_kernel(%arg0: i32, %arg1: memref<4x128xf32, #tpu.memory_space<vmem>>, %arg2: memref<32x4xf32, #tpu.memory_space<vmem>>, %arg3: memref<32x1xf32, #tpu.memory_space<vmem>>, %arg4: memref<32x32xf32, #tpu.memory_space<vmem>>, %arg5: memref<32x1xf32, #tpu.memory_space<vmem>>, %arg6: memref<4x32xf32, #tpu.memory_space<vmem>>, %arg7: memref<4x1xf32, #tpu.memory_space<vmem>>, %arg8: memref<4x128xf32, #tpu.memory_space<vmem>>) attributes {dimension_semantics = [#tpu.dimension_semantics<parallel>], iteration_bounds = array<i64: 1>, scalar_prefetch = 0 : i64, scratch_operands = 0 : i64, tpu.core_type = #tpu.core_type<tc>, window_params = [{transform_indices = @transform_0, window_bounds = array<i64: 4, 128>}, {pipeline_mode = #tpu.pipeline_mode<synchronous>, transform_indices = @transform_1, window_bounds = array<i64: 32, 4>}, {pipeline_mode = #tpu.pipeline_mode<synchronous>, transform_indices = @transform_2, window_bounds = array<i64: 32, 1>}, {pipeline_mode = #tpu.pipeline_mode<synchronous>, transform_indices = @transform_3, window_bounds = array<i64: 32, 32>}, {pipeline_mode = #tpu.pipeline_mode<synchronous>, transform_indices = @transform_4, window_bounds = array<i64: 32, 1>}, {pipeline_mode = #tpu.pipeline_mode<synchronous>, transform_indices = @transform_5, window_bounds = array<i64: 4, 32>}, {pipeline_mode = #tpu.pipeline_mode<synchronous>, transform_indices = @transform_6, window_bounds = array<i64: 4, 1>}, {transform_indices = @transform_7, window_bounds = array<i64: 4, 128>}]} {
    %c0 = arith.constant 0 : index
    %c0_0 = arith.constant 0 : index
    %0 = vector.load %arg1[%c0, %c0_0] : memref<4x128xf32, #tpu.memory_space<vmem>>, vector<4x128xf32>
    %c0_1 = arith.constant 0 : index
    %c0_2 = arith.constant 0 : index
    %1 = vector.load %arg2[%c0_1, %c0_2] : memref<32x4xf32, #tpu.memory_space<vmem>>, vector<32x4xf32>
    %cst = arith.constant dense<0.000000e+00> : vector<32x128xf32>
    %2 = tpu.matmul %1, %0, %cst {dimension_numbers = #tpu.dot_dimension_numbers<[1], [0], [0], [1], [0, 0, 1, 1], [], []>} : vector<32x4xf32>, vector<4x128xf32>, vector<32x128xf32> -> vector<32x128xf32>
    %c0_3 = arith.constant 0 : index
    %c0_4 = arith.constant 0 : index
    %3 = vector.load %arg3[%c0_3, %c0_4] : memref<32x1xf32, #tpu.memory_space<vmem>>, vector<32x1xf32>
    %4 = vector.broadcast %3 : vector<32x1xf32> to vector<32x128xf32>
    %5 = arith.addf %2, %4 : vector<32x128xf32>
    %cst_5 = arith.constant 0.000000e+00 : f32
    %6 = vector.broadcast %cst_5 : f32 to vector<32x128xf32>
    %7 = arith.maximumf %5, %6 : vector<32x128xf32>
    %c0_6 = arith.constant 0 : index
    %c0_7 = arith.constant 0 : index
    %8 = vector.load %arg4[%c0_6, %c0_7] : memref<32x32xf32, #tpu.memory_space<vmem>>, vector<32x32xf32>
    %cst_8 = arith.constant dense<0.000000e+00> : vector<32x128xf32>
    %9 = tpu.matmul %8, %7, %cst_8 {dimension_numbers = #tpu.dot_dimension_numbers<[1], [0], [0], [1], [0, 0, 1, 1], [], []>} : vector<32x32xf32>, vector<32x128xf32>, vector<32x128xf32> -> vector<32x128xf32>
    %c0_9 = arith.constant 0 : index
    %c0_10 = arith.constant 0 : index
    %10 = vector.load %arg5[%c0_9, %c0_10] : memref<32x1xf32, #tpu.memory_space<vmem>>, vector<32x1xf32>
    %11 = vector.broadcast %10 : vector<32x1xf32> to vector<32x128xf32>
    %12 = arith.addf %9, %11 : vector<32x128xf32>
    %cst_11 = arith.constant 0.000000e+00 : f32
    %13 = vector.broadcast %cst_11 : f32 to vector<32x128xf32>
    %14 = arith.maximumf %12, %13 : vector<32x128xf32>
    %c0_12 = arith.constant 0 : index
    %c0_13 = arith.constant 0 : index
    %15 = vector.load %arg6[%c0_12, %c0_13] : memref<4x32xf32, #tpu.memory_space<vmem>>, vector<4x32xf32>
    %cst_14 = arith.constant dense<0.000000e+00> : vector<4x128xf32>
    %16 = tpu.matmul %15, %14, %cst_14 {dimension_numbers = #tpu.dot_dimension_numbers<[1], [0], [0], [1], [0, 0, 1, 1], [], []>} : vector<4x32xf32>, vector<32x128xf32>, vector<4x128xf32> -> vector<4x128xf32>
    %c0_15 = arith.constant 0 : index
    %c0_16 = arith.constant 0 : index
    %17 = vector.load %arg7[%c0_15, %c0_16] : memref<4x1xf32, #tpu.memory_space<vmem>>, vector<4x1xf32>
    %18 = vector.broadcast %17 : vector<4x1xf32> to vector<4x128xf32>
    %19 = arith.addf %16, %18 : vector<4x128xf32>
    %c0_17 = arith.constant 0 : index
    %c0_18 = arith.constant 0 : index
    %20 = vector.load %arg8[%c0_17, %c0_18] : memref<4x128xf32, #tpu.memory_space<vmem>>, vector<4x128xf32>
    tpu.vector_store %arg8[%c0_17, %c0_18], %19 {strides = array<i32>} : memref<4x128xf32, #tpu.memory_space<vmem>>, vector<4x128xf32>,
    return
  }
  func.func @transform_0(%arg0: i32) -> (i32, i32) {
    %c0_i32 = arith.constant 0 : i32
    %c0_i32_0 = arith.constant 0 : i32
    return %c0_i32, %arg0 : i32, i32
  }
  func.func @transform_1(%arg0: i32) -> (i32, i32) {
    %c0_i32 = arith.constant 0 : i32
    %c0_i32_0 = arith.constant 0 : i32
    %c0_i32_1 = arith.constant 0 : i32
    return %c0_i32, %c0_i32_0 : i32, i32
  }
  func.func @transform_2(%arg0: i32) -> (i32, i32) {
    %c0_i32 = arith.constant 0 : i32
    %c0_i32_0 = arith.constant 0 : i32
    %c0_i32_1 = arith.constant 0 : i32
    return %c0_i32, %c0_i32_0 : i32, i32
  }
  func.func @transform_3(%arg0: i32) -> (i32, i32) {
    %c0_i32 = arith.constant 0 : i32
    %c0_i32_0 = arith.constant 0 : i32
    %c0_i32_1 = arith.constant 0 : i32
    return %c0_i32, %c0_i32_0 : i32, i32
  }
  func.func @transform_4(%arg0: i32) -> (i32, i32) {
    %c0_i32 = arith.constant 0 : i32
    %c0_i32_0 = arith.constant 0 : i32
    %c0_i32_1 = arith.constant 0 : i32
    return %c0_i32, %c0_i32_0 : i32, i32
  }
  func.func @transform_5(%arg0: i32) -> (i32, i32) {
    %c0_i32 = arith.constant 0 : i32
    %c0_i32_0 = arith.constant 0 : i32
    %c0_i32_1 = arith.constant 0 : i32
    return %c0_i32, %c0_i32_0 : i32, i32
  }
  func.func @transform_6(%arg0: i32) -> (i32, i32) {
    %c0_i32 = arith.constant 0 : i32
    %c0_i32_0 = arith.constant 0 : i32
    %c0_i32_1 = arith.constant 0 : i32
    return %c0_i32, %c0_i32_0 : i32, i32
  }
  func.func @transform_7(%arg0: i32) -> (i32, i32) {
    %c0_i32 = arith.constant 0 : i32
    %c0_i32_0 = arith.constant 0 : i32
    return %c0_i32, %arg0 : i32, i32
  }
}

</mosaic_0001>

<bundles_post_ra>
// kernel: custom_mlp_forward.1
= control target key start
LH: loop header
LB: loop body
LE: loop exit
PB: predicated region body
PF: predicated region fallthrough
CT: control target
= control target key end

     0   :  { %vm68_vm0 = vcmask 1043456   ;;  %vm55_vm1 = vcmask 31744   ;;  %v233_v2 = vmov 0   ;;  %vm133_vm2 = vcmask 261120   ;;  %s343_s0 = inlined_call_operand.vmem [shape: f32[4,128], index: 0, kind: input, shape index: {}]   ;;  %s344_s1 = inlined_call_operand.vmem [shape: f32[32,4], index: 1, kind: input, shape index: {}]   ;;  %s345_s2 = inlined_call_operand.vmem [shape: f32[32,1], index: 2, kind: input, shape index: {}]   ;;  %s346_s4 = inlined_call_operand.vmem [shape: f32[32,1], index: 4, kind: input, shape index: {}]   ;;  %s347_s6 = inlined_call_operand.vmem [shape: f32[4,1], index: 6, kind: input, shape index: {}]   ;;  %s348_s3 = inlined_call_operand.vmem [shape: f32[32,32], index: 3, kind: input, shape index: {}]   ;;  %s349_s5 = inlined_call_operand.vmem [shape: f32[4,32], index: 5, kind: input, shape index: {}]   ;;  %s350_s7 = inlined_call_operand.vmem [shape: f32[4,128], index: 7, kind: output, shape index: {}]  }
   0x1   :  { %v26_v0 = vld [vmem:[%s343_s0] sm:$0xf]  ;;  %231 = vset.pattern.permute.xlu1 %v233_v2  ;;  %230 = vset.pattern.permute.xlu0 %v233_v2  ;;  %v30_v3 = vld [vmem:[%s344_s1 + $0x18] sm:$0xff]  ;;  %v32_v5 = vld [vmem:[%s345_s2 + $0x8] sm:$0xff] }
   0x2   :  { %v27_v1 = vld [vmem:[%s344_s1] sm:$0xff]  ;;  %214 = vmatpush.msk.msra.mxu0 %vm68_vm0, %v26_v0  ;;  %224 = vmatpush.msk.msra.mxu2 %vm68_vm0, %v26_v0  ;;  %v34_v4 = vld [vmem:[%s345_s2 + $0x18] sm:$0xff]  ;;  %v28_v6 = vld [vmem:[%s344_s1 + $0x8] sm:$0xff] }
   0x3   :  { %215 = vmatmul.msk.f32.vlgmr.msra.gmra.mxu0 %vm55_vm1, %v27_v1  ;;  %218 = vmatmul.msk.f32.vlgmr.msra.gmra.mxu2 %vm55_vm1, %v30_v3  ;;  %v33_v7 = vld [vmem:[%s345_s2 + $0x10] sm:$0xff]  ;;  %v31_v8 = vld [vmem:[%s345_s2] sm:$0xff]  ;;  %v110_v10 = vld [vmem:[%s346_s4 + $0x8] sm:$0xff] }
   0x4   :  { %52 = vperm.xlu0 %230, %v34_v4   ;;  %42 = vperm.xlu1 %231, %v32_v5   ;;  %v29_v9 = vld [vmem:[%s344_s1 + $0x10] sm:$0xff]  ;;  %v109_v11 = vld [vmem:[%s346_s4] sm:$0xff]  ;;  %v112_v13 = vld [vmem:[%s346_s4 + $0x18] sm:$0xff] }
   0x5   :  { %232 = vset.pattern.permute.xlu2 %v233_v2  ;;  %v111_v20 = vld [vmem:[%s346_s4 + $0x10] sm:$0xff]  ;;  %v180_v26 = vld [vmem:[%s347_s6] sm:$0xf]  ;;  %v106_v33 = vld [vmem:[%s348_s3 + $0x8] sm:$0xff] }
   0x6   :  { %130 = vperm.xlu2 %232, %v112_v13   ;;  %v105_v31 = vld [vmem:[%s348_s3] sm:$0xff]  ;;  %v107_v32 = vld [vmem:[%s348_s3 + $0x10] sm:$0xff]  ;;  %v108_v34 = vld [vmem:[%s348_s3 + $0x18] sm:$0xff] }
   0x7   :  { %v179_v51 = vld [vmem:[%s349_s5] sm:$0xf] }
   0xb   :  { %216 = vmatmul.msk.f32.gmra.mxu0 %vm55_vm1, %v28_v6 }
   0xc   :  { %47 = vperm.xlu0 %230, %v33_v7   ;;  %37 = vperm.xlu1 %231, %v31_v8  }
   0xe   :  { %125 = vperm.xlu2 %232, %v111_v20  }
  0x13   :  { %217 = vmatmul.msk.f32.gmra.mxu0 %vm55_vm1, %v29_v9 }
  0x14   :  { %120 = vperm.xlu0 %230, %v110_v10   ;;  %115 = vperm.xlu1 %231, %v109_v11  }
  0x16   :  { %183 = vperm.xlu2 %232, %v180_v26  }
  0x60   :  { %v131_v35 = vpop.permute.xlu2 %130 }
  0x68   :  { %v126_v38 = vpop.permute.xlu2 %125 }
  0x70   :  { %v184_v52 = vpop.permute.xlu2 %183 }
  0x76   :  { %v53_v14 = vpop.permute.xlu0 %52  ;;  %v43_v15 = vpop.permute.xlu1 %42 }
  0x7e   :  { %v48_v21 = vpop.permute.xlu0 %47  ;;  %v38_v22 = vpop.permute.xlu1 %37 }
  0x80   :  { %v89_v12 = vpop.f32.mrf.mxu0 }
  0x81   :  { %v90_v27 = vadd.f32 %v89_v12, %v38_v22 }
  0x83   :  { %v101_v30 = vmax.f32 %v90_v27, 0.0 }
  0x86   :  { %v98_v16 = vpop.f32.mrf.mxu2  ;;  %v121_v43 = vpop.permute.xlu0 %120 }
  0x87   :  { %v99_v17 = vadd.f32 %v98_v16, %v53_v14  ;;  %v116_v46 = vpop.permute.xlu1 %115 }
  0x88   :  { %v92_v18 = vpop.f32.mrf.mxu0 }
  0x89   :  { %v104_v19 = vmax.f32 %v99_v17, 0.0  ;;  %v93_v24 = vadd.f32 %v92_v18, %v43_v15 }
  0x8b   :  { %158 = vmatpush.msra.mxu1 %v104_v19  ;;  %225 = vmatpush.msra.mxu3 %v104_v19  ;;  %v102_v29 = vmax.f32 %v93_v24, 0.0 }
  0x90   :  { %v95_v23 = vpop.f32.mrf.mxu0 }
  0x91   :  { %v96_v25 = vadd.f32 %v95_v23, %v48_v21 }
  0x93   :  { %v103_v28 = vmax.f32 %v96_v25, 0.0 }
  0x95   :  { %159 = vmatpush.msra.mxu1 %v103_v28  ;;  %226 = vmatpush.msra.mxu3 %v103_v28 }
  0x97   :  { %160 = vmatpush.msra.mxu1 %v102_v29  ;;  %227 = vmatpush.msra.mxu3 %v102_v29 }
  0x99   :  { %161 = vmatpush.msra.mxu1 %v101_v30  ;;  %228 = vmatpush.msra.mxu3 %v101_v30 }
  0x9a   :  { %219 = vmatmul.msk.f32.vlgmr.msra.gmra.mxu1 %vm133_vm2, %v105_v31  ;;  %221 = vmatmul.msk.f32.vlgmr.msra.gmra.mxu3 %vm133_vm2, %v107_v32 }
  0xa2   :  { %220 = vmatmul.msk.f32.gmra.mxu1 %vm133_vm2, %v106_v33  ;;  %222 = vmatmul.msk.f32.gmra.mxu3 %vm133_vm2, %v108_v34 }
 0x117   :  { %v163_v36 = vpop.f32.mrf.mxu1 }
 0x118   :  { %v164_v47 = vadd.f32 %v163_v36, %v116_v46 }
 0x11a   :  { %v175_v50 = vmax.f32 %v164_v47, 0.0 }
 0x11d   :  { %v169_v37 = vpop.f32.mrf.mxu3 }
 0x11e   :  { %v170_v41 = vadd.f32 %v169_v37, %v126_v38 }
 0x11f   :  { %v166_v39 = vpop.f32.mrf.mxu1 }
 0x120   :  { %v167_v44 = vadd.f32 %v166_v39, %v121_v43  ;;  %v177_v48 = vmax.f32 %v170_v41, 0.0 }
 0x122   :  { %v176_v49 = vmax.f32 %v167_v44, 0.0 }
 0x125   :  { %v172_v40 = vpop.f32.mrf.mxu3 }
 0x126   :  { %v173_v42 = vadd.f32 %v172_v40, %v131_v35 }
 0x128   :  { %v178_v45 = vmax.f32 %v173_v42, 0.0 }
 0x12a   :  { %201 = vmatpush.msrb.mxu2 %v178_v45 }
 0x12c   :  { %202 = vmatpush.msrb.mxu2 %v177_v48 }
 0x12e   :  { %203 = vmatpush.msrb.mxu2 %v176_v49 }
 0x130   :  { %204 = vmatpush.msrb.mxu2 %v175_v50 }
 0x131   :  { %223 = vmatmul.msk.f32.vlgmr.msrb.gmra.mxu2 %vm133_vm2, %v179_v51 }
 0x1b4   :  { %v206_v53 = vpop.f32.mrf.mxu2 }
 0x1b5   :  { %v207_v54 = vadd.f32 %v206_v53, %v184_v52 }
 0x1b7   :  { %209 = vst [vmem:[%s350_s7] sm:$0xf] %v207_v54 }

</bundles_post_ra>
